<compile_context>
chip_gen: v5e
topology: v5e:2x2
jax: 0.10.0
libtpu: 0.0.40
codegen_flags: <defaults>
</compile_context>

<pallas_src>
import math
import jax
import jax.numpy as jnp
from jax.experimental import pallas as pl
from jax.experimental.pallas import tpu as pltpu


def _round_up(x, m):
    return ((x + m - 1) // m) * m


def _vmem_capacity_bytes():
    """Best-effort query of per-core VMEM capacity; conservative fallback."""
    try:
        info = pltpu.get_tpu_info()
        for attr in ("vmem_capacity_bytes", "vmem_bytes", "vmem_size_bytes"):
            v = getattr(info, attr, None)
            if v:
                return int(v)
    except Exception:
        pass
    return 64 << 20  # v7x per-TensorCore physical VMEM (most restrictive)


def _make_conv_kernel(offs, C, KKC, KKCp, TL, n_tiles):
    pad_rows = KKCp - KKC

    def kernel(w_ref, x_ref, o_ref, xcol_ref):
        # w_ref:    (TF, KKCp)       bf16 flat filters (resident when TF == Fp)
        # x_ref:    (C, HW_in_pad)   bf16, one image, flattened padded spatial
        # o_ref:    (TF, HW_out_pad) activations (lane-dense stores)
        # xcol_ref: (KKCp, TL)       bf16 scratch: in-kernel im2col tile
        if pad_rows:  # zero the contraction padding once per grid step
            xcol_ref[pl.ds(KKC, pad_rows), :] = jnp.zeros(
                (pad_rows, TL), xcol_ref.dtype)
        w = w_ref[...]
        for t in range(n_tiles):                      # static lane-tile loop
            base = t * TL                             # multiple of 128
            # In-kernel unfold: k*k shifted views of the image block.
            for i, off in enumerate(offs):
                xcol_ref[pl.ds(i * C, C), :] = (
                    x_ref[:, base + off:base + off + TL])
            acc = jnp.dot(w, xcol_ref[...],
                          preferred_element_type=jnp.float32)
            o_ref[:, base:base + TL] = jnp.tanh(acc).astype(o_ref.dtype)

    return kernel


def conv_layer_forward(x, kernel, *, stride=1, padding=0,
                       out_dtype=jnp.float32):
    """ConvLayer.forward: tanh(conv2d(x, kernel)). Returns (B, F, O, O)."""
    B, C, H, W = x.shape
    F_, C_k, kh, kw = kernel.shape
    assert C == C_k
    # The module uses scalar input_size / kernel_size -> square only.
    assert H == W and kh == kw, "ConvLayer assumes square inputs and kernels"
    k = kh
    Hp = H + 2 * padding
    O = (Hp - k) // stride + 1
    assert O >= 1

    # ---- prep (all in bf16: halves XLA prep + HBM traffic) -----------------
    xb = x.astype(jnp.bfloat16)
    if padding > 0:
        xb = jnp.pad(xb, ((0, 0), (0, 0),
                          (padding, padding), (padding, padding)))
    HW = Hp * Hp
    HW_out_pad = _round_up(HW, 128)          # output positions per image
    max_off = (k - 1) * (Hp + 1)             # largest unfold shift
    HW_in_pad = _round_up(HW_out_pad + max_off, 128)
    xflat = jnp.pad(xb.reshape(B, C, HW),
                    ((0, 0), (0, 0), (0, HW_in_pad - HW)))

    KK = k * k
    KKC = KK * C                             # contraction size
    KKCp = _round_up(KKC, 16)                # bf16 sublane packing
    Fp = _round_up(F_, 8)

    # Flat filters with column ordering (ki*k + kj)*C + c — matches the order
    # in which the kernel stacks the shifted views.  (Keeping the weight in
    # bf16 matches the previous version; use f32 if training needs tighter
    # numerics.)
    w = jnp.transpose(kernel, (0, 2, 3, 1)).reshape(F_, KKC)
    w = jnp.pad(w, ((0, Fp - F_), (0, KKCp - KKC))).astype(jnp.bfloat16)

    offs = [ki * Hp + kj for ki in range(k) for kj in range(k)]

    # ---- VMEM-budget-driven tile selection ----------------------------------
    out_bytes = jnp.dtype(out_dtype).itemsize
    vmem_cap = _vmem_capacity_bytes()
    budget = int(0.70 * vmem_cap)            # ~45 MiB on v7x, ~90 MiB v5e/v6e

    # Lane tile for the in-kernel im2col scratch: multiple of 128, divides
    # HW_out_pad, keeps the scratch + f32 accumulator modest.
    tl_cands = ([HW_out_pad] if HW_out_pad <= 2048 else []) + \
               [c for c in (2048, 1024, 512, 256, 128) if HW_out_pad % c == 0]
    TL = tl_cands[-1]
    for cand in tl_cands:
        if KKCp * cand * 2 + Fp * cand * 4 <= (8 << 20):
            TL = cand
            break
    n_tiles = HW_out_pad // TL

    in_block = C * HW_in_pad * 2             # one bf16 image slab

    def total_bytes(tf):
        w_bufs = 1 if tf == Fp else 2        # resident weight -> single buffer
        return (2 * in_block                             # double-buffered input
                + w_bufs * tf * KKCp * 2                 # weight block(s)
                + 2 * tf * HW_out_pad * out_bytes        # double-buffered output
                + KKCp * TL * 2 + tf * TL * 4            # im2col scratch + acc
                + (2 << 20))                             # headroom

    tf_cands = [d for d in range(Fp, 7, -8) if Fp % d == 0]
    TF = tf_cands[-1]
    for tf in tf_cands:
        if total_bytes(tf) <= budget:
            TF = tf
            break
    # TODO(synk): if even the smallest TF exceeds the budget (huge C*H*W), a
    # halo-tiled spatial axis is required; we clamp vmem_limit below.
    vmem_limit = int(min(max(total_bytes(TF), 16 << 20), 0.85 * vmem_cap))

    grid = (B, Fp // TF)
    cost = pl.CostEstimate(
        flops=2 * B * Fp * KKCp * HW_out_pad,
        transcendentals=B * Fp * HW_out_pad,
        bytes_accessed=(xflat.size * 2 + w.size * 2
                        + B * Fp * HW_out_pad * out_bytes),
    )

    out = pl.pallas_call(
        _make_conv_kernel(offs, C, KKC, KKCp, TL, n_tiles),
        out_shape=jax.ShapeDtypeStruct((B, Fp, HW_out_pad), out_dtype),
        grid_spec=pltpu.PrefetchScalarGridSpec(
            num_scalar_prefetch=0,
            grid=grid,
            in_specs=[
                pl.BlockSpec((TF, KKCp), lambda b, fi: (fi, 0)),
                pl.BlockSpec((None, C, HW_in_pad), lambda b, fi: (b, 0, 0)),
            ],
            out_specs=pl.BlockSpec((None, TF, HW_out_pad),
                                   lambda b, fi: (b, fi, 0)),
            scratch_shapes=[pltpu.VMEM((KKCp, TL), jnp.bfloat16)],
        ),
        compiler_params=pltpu.CompilerParams(
            dimension_semantics=("parallel", "parallel"),
            vmem_limit_bytes=vmem_limit),
        cost_estimate=cost,
    )(w, xflat)

    # (B, Fp, HW_out_pad) -> valid filters / spatial positions -> (B, F, O, O)
    y = out[:, :F_, :HW].reshape(B, F_, Hp, Hp)
    lim = (O - 1) * stride + 1
    return y[:, :, :lim:stride, :lim:stride].astype(x.dtype)


if __name__ == "__main__":
    # ConvLayer hyper-params (small, consistent with the module's __init__).
    batch_size = 2
    num_channels = 4
    input_size = 16
    num_filters = 8
    kernel_size = 3
    padding = 0
    stride = 1
    output_size = math.floor(
        (input_size + 2 * padding - kernel_size) / stride) + 1   # 14

    key = jax.random.PRNGKey(0)
    kx, kw_ = jax.random.split(key)
    x = jax.random.normal(
        kx, (batch_size, num_channels, input_size, input_size), jnp.float32)
    # kernel ~ Normal(mean=0, std=0.05) as in ConvLayer.__init__
    kernel = 0.05 * jax.random.normal(
        kw_, (num_filters, num_channels, kernel_size, kernel_size),
        jnp.float32)

    out = conv_layer_forward(x, kernel, stride=stride, padding=padding)
    out = jax.block_until_ready(out)
    assert out.shape == (batch_size, num_filters, output_size, output_size)

    # Sanity check against a pure-JAX reference (direct conv + tanh).
    # bf16 MXU operands -> relaxed tolerance.
    ref = jnp.tanh(jax.lax.conv_general_dilated(
        x, kernel, window_strides=(stride, stride), padding="VALID",
        dimension_numbers=("NCHW", "OIHW", "NCHW")))
    assert jnp.allclose(out, ref, atol=1e-2, rtol=1e-2), (
        float(jnp.max(jnp.abs(out - ref))))

    print("KERNEL_OK")
</pallas_src>

<mosaic_0001>
module attributes {stable_mosaic.version = 11 : i64} {
  func.func @kernel(%arg0: i32, %arg1: i32, %arg2: memref<8x48xbf16, #tpu.memory_space<vmem>>, %arg3: memref<1x4x384xbf16, #tpu.memory_space<vmem>>, %arg4: memref<1x8x256xf32, #tpu.memory_space<vmem>>, %arg5: memref<48x256xbf16, #tpu.memory_space<vmem>>) attributes {dimension_semantics = [#tpu.dimension_semantics<parallel>, #tpu.dimension_semantics<parallel>], iteration_bounds = array<i64: 2, 1>, scalar_prefetch = 0 : i64, scratch_operands = 1 : i64, tpu.core_type = #tpu.core_type<tc>, window_params = [{transform_indices = @transform_0, window_bounds = array<i64: 8, 48>}, {transform_indices = @transform_1, window_bounds = array<i64: 1, 4, 384>}, {transform_indices = @transform_2, window_bounds = array<i64: 1, 8, 256>}]} {
    %cst = arith.constant 0.000000e+00 : bf16
    %0 = vector.broadcast %cst : bf16 to vector<12x256xbf16>
    %c36 = arith.constant 36 : index
    %c0 = arith.constant 0 : index
    %1 = vector.load %arg5[%c36, %c0] : memref<48x256xbf16, #tpu.memory_space<vmem>>, vector<12x256xbf16>
    tpu.vector_store %arg5[%c36, %c0], %0 {strides = array<i32>} : memref<48x256xbf16, #tpu.memory_space<vmem>>, vector<12x256xbf16>,
    %c0_0 = arith.constant 0 : index
    %c0_1 = arith.constant 0 : index
    %2 = vector.load %arg2[%c0_0, %c0_1] : memref<8x48xbf16, #tpu.memory_space<vmem>>, vector<8x48xbf16>
    %c0_2 = arith.constant 0 : index
    %c0_3 = arith.constant 0 : index
    %c0_4 = arith.constant 0 : index
    %3 = vector.load %arg3[%c0_2, %c0_3, %c0_4] : memref<1x4x384xbf16, #tpu.memory_space<vmem>>, vector<1x4x256xbf16>
    %4 = vector.shape_cast %3 : vector<1x4x256xbf16> to vector<4x256xbf16>
    %c0_5 = arith.constant 0 : index
    %c0_6 = arith.constant 0 : index
    %5 = vector.load %arg5[%c0_5, %c0_6] : memref<48x256xbf16, #tpu.memory_space<vmem>>, vector<4x256xbf16>
    tpu.vector_store %arg5[%c0_5, %c0_6], %4 {strides = array<i32>} : memref<48x256xbf16, #tpu.memory_space<vmem>>, vector<4x256xbf16>,
    %c0_7 = arith.constant 0 : index
    %c0_8 = arith.constant 0 : index
    %c1 = arith.constant 1 : index
    %6 = vector.load %arg3[%c0_7, %c0_8, %c1] : memref<1x4x384xbf16, #tpu.memory_space<vmem>>, vector<1x4x256xbf16>
    %7 = vector.shape_cast %6 : vector<1x4x256xbf16> to vector<4x256xbf16>
    %c4 = arith.constant 4 : index
    %c0_9 = arith.constant 0 : index
    %8 = vector.load %arg5[%c4, %c0_9] : memref<48x256xbf16, #tpu.memory_space<vmem>>, vector<4x256xbf16>
    tpu.vector_store %arg5[%c4, %c0_9], %7 {strides = array<i32>} : memref<48x256xbf16, #tpu.memory_space<vmem>>, vector<4x256xbf16>,
    %c0_10 = arith.constant 0 : index
    %c0_11 = arith.constant 0 : index
    %c2 = arith.constant 2 : index
    %9 = vector.load %arg3[%c0_10, %c0_11, %c2] : memref<1x4x384xbf16, #tpu.memory_space<vmem>>, vector<1x4x256xbf16>
    %10 = vector.shape_cast %9 : vector<1x4x256xbf16> to vector<4x256xbf16>
    %c8 = arith.constant 8 : index
    %c0_12 = arith.constant 0 : index
    %11 = vector.load %arg5[%c8, %c0_12] : memref<48x256xbf16, #tpu.memory_space<vmem>>, vector<4x256xbf16>
    tpu.vector_store %arg5[%c8, %c0_12], %10 {strides = array<i32>} : memref<48x256xbf16, #tpu.memory_space<vmem>>, vector<4x256xbf16>,
    %c0_13 = arith.constant 0 : index
    %c0_14 = arith.constant 0 : index
    %c16 = arith.constant 16 : index
    %12 = vector.load %arg3[%c0_13, %c0_14, %c16] : memref<1x4x384xbf16, #tpu.memory_space<vmem>>, vector<1x4x256xbf16>
    %13 = vector.shape_cast %12 : vector<1x4x256xbf16> to vector<4x256xbf16>
    %c12 = arith.constant 12 : index
    %c0_15 = arith.constant 0 : index
    %14 = vector.load %arg5[%c12, %c0_15] : memref<48x256xbf16, #tpu.memory_space<vmem>>, vector<4x256xbf16>
    tpu.vector_store %arg5[%c12, %c0_15], %13 {strides = array<i32>} : memref<48x256xbf16, #tpu.memory_space<vmem>>, vector<4x256xbf16>,
    %c0_16 = arith.constant 0 : index
    %c0_17 = arith.constant 0 : index
    %c17 = arith.constant 17 : index
    %15 = vector.load %arg3[%c0_16, %c0_17, %c17] : memref<1x4x384xbf16, #tpu.memory_space<vmem>>, vector<1x4x256xbf16>
    %16 = vector.shape_cast %15 : vector<1x4x256xbf16> to vector<4x256xbf16>
    %c16_18 = arith.constant 16 : index
    %c0_19 = arith.constant 0 : index
    %17 = vector.load %arg5[%c16_18, %c0_19] : memref<48x256xbf16, #tpu.memory_space<vmem>>, vector<4x256xbf16>
    tpu.vector_store %arg5[%c16_18, %c0_19], %16 {strides = array<i32>} : memref<48x256xbf16, #tpu.memory_space<vmem>>, vector<4x256xbf16>,
    %c0_20 = arith.constant 0 : index
    %c0_21 = arith.constant 0 : index
    %c18 = arith.constant 18 : index
    %18 = vector.load %arg3[%c0_20, %c0_21, %c18] : memref<1x4x384xbf16, #tpu.memory_space<vmem>>, vector<1x4x256xbf16>
    %19 = vector.shape_cast %18 : vector<1x4x256xbf16> to vector<4x256xbf16>
    %c20 = arith.constant 20 : index
    %c0_22 = arith.constant 0 : index
    %20 = vector.load %arg5[%c20, %c0_22] : memref<48x256xbf16, #tpu.memory_space<vmem>>, vector<4x256xbf16>
    tpu.vector_store %arg5[%c20, %c0_22], %19 {strides = array<i32>} : memref<48x256xbf16, #tpu.memory_space<vmem>>, vector<4x256xbf16>,
    %c0_23 = arith.constant 0 : index
    %c0_24 = arith.constant 0 : index
    %c32 = arith.constant 32 : index
    %21 = vector.load %arg3[%c0_23, %c0_24, %c32] : memref<1x4x384xbf16, #tpu.memory_space<vmem>>, vector<1x4x256xbf16>
    %22 = vector.shape_cast %21 : vector<1x4x256xbf16> to vector<4x256xbf16>
    %c24 = arith.constant 24 : index
    %c0_25 = arith.constant 0 : index
    %23 = vector.load %arg5[%c24, %c0_25] : memref<48x256xbf16, #tpu.memory_space<vmem>>, vector<4x256xbf16>
    tpu.vector_store %arg5[%c24, %c0_25], %22 {strides = array<i32>} : memref<48x256xbf16, #tpu.memory_space<vmem>>, vector<4x256xbf16>,
    %c0_26 = arith.constant 0 : index
    %c0_27 = arith.constant 0 : index
    %c33 = arith.constant 33 : index
    %24 = vector.load %arg3[%c0_26, %c0_27, %c33] : memref<1x4x384xbf16, #tpu.memory_space<vmem>>, vector<1x4x256xbf16>
    %25 = vector.shape_cast %24 : vector<1x4x256xbf16> to vector<4x256xbf16>
    %c28 = arith.constant 28 : index
    %c0_28 = arith.constant 0 : index
    %26 = vector.load %arg5[%c28, %c0_28] : memref<48x256xbf16, #tpu.memory_space<vmem>>, vector<4x256xbf16>
    tpu.vector_store %arg5[%c28, %c0_28], %25 {strides = array<i32>} : memref<48x256xbf16, #tpu.memory_space<vmem>>, vector<4x256xbf16>,
    %c0_29 = arith.constant 0 : index
    %c0_30 = arith.constant 0 : index
    %c34 = arith.constant 34 : index
    %27 = vector.load %arg3[%c0_29, %c0_30, %c34] : memref<1x4x384xbf16, #tpu.memory_space<vmem>>, vector<1x4x256xbf16>
    %28 = vector.shape_cast %27 : vector<1x4x256xbf16> to vector<4x256xbf16>
    %c32_31 = arith.constant 32 : index
    %c0_32 = arith.constant 0 : index
    %29 = vector.load %arg5[%c32_31, %c0_32] : memref<48x256xbf16, #tpu.memory_space<vmem>>, vector<4x256xbf16>
    tpu.vector_store %arg5[%c32_31, %c0_32], %28 {strides = array<i32>} : memref<48x256xbf16, #tpu.memory_space<vmem>>, vector<4x256xbf16>,
    %c0_33 = arith.constant 0 : index
    %c0_34 = arith.constant 0 : index
    %30 = vector.load %arg5[%c0_33, %c0_34] : memref<48x256xbf16, #tpu.memory_space<vmem>>, vector<48x256xbf16>
    %cst_35 = arith.constant dense<0.000000e+00> : vector<8x256xf32>
    %31 = tpu.matmul %2, %30, %cst_35 {dimension_numbers = #tpu.dot_dimension_numbers<[1], [0], [0], [1], [0, 0, 1, 1], [], []>} : vector<8x48xbf16>, vector<48x256xbf16>, vector<8x256xf32> -> vector<8x256xf32>
    %32 = math.tanh %31 : vector<8x256xf32>
    %c0_36 = arith.constant 0 : index
    %c0_37 = arith.constant 0 : index
    %c0_38 = arith.constant 0 : index
    %33 = vector.load %arg4[%c0_36, %c0_37, %c0_38] : memref<1x8x256xf32, #tpu.memory_space<vmem>>, vector<1x8x256xf32>
    %34 = vector.shape_cast %33 : vector<1x8x256xf32> to vector<8x256xf32>
    %35 = vector.shape_cast %32 : vector<8x256xf32> to vector<1x8x256xf32>
    tpu.vector_store %arg4[%c0_36, %c0_37, %c0_38], %35 {strides = array<i32>} : memref<1x8x256xf32, #tpu.memory_space<vmem>>, vector<1x8x256xf32>,
    return
  }
  func.func @transform_0(%arg0: i32, %arg1: i32) -> (i32, i32) {
    %c0_i32 = arith.constant 0 : i32
    %c0_i32_0 = arith.constant 0 : i32
    return %arg1, %c0_i32 : i32, i32
  }
  func.func @transform_1(%arg0: i32, %arg1: i32) -> (i32, i32, i32) {
    %c0_i32 = arith.constant 0 : i32
    %c0_i32_0 = arith.constant 0 : i32
    %c0_i32_1 = arith.constant 0 : i32
    return %arg0, %c0_i32, %c0_i32_0 : i32, i32, i32
  }
  func.func @transform_2(%arg0: i32, %arg1: i32) -> (i32, i32, i32) {
    %c0_i32 = arith.constant 0 : i32
    %c0_i32_0 = arith.constant 0 : i32
    return %arg0, %arg1, %c0_i32 : i32, i32, i32
  }
}

</mosaic_0001>

<bundles_post_ra>
// kernel: tpu_custom_call.1
= control target key start
LH: loop header
LB: loop body
LE: loop exit
PB: predicated region body
PF: predicated region fallthrough
CT: control target
= control target key end

     0   :  { %7 = vsyncpa [#allocation4], 0  ;;  %s1013_s0 = inlined_call_operand.hbm [shape: bf16[8,48], index: 0, kind: input, shape index: {}]   ;;  %s1014_s1 = inlined_call_operand.hbm [shape: bf16[2,4,384], index: 1, kind: input, shape index: {}]   ;;  %s1015_s2 = inlined_call_operand.hbm [shape: f32[2,8,256], index: 2, kind: output, shape index: {}]  }
   0x1   :  { %8 = vsyncpa [#allocation7], 0 }
   0x2   :  { %10 = vsyncpa [#allocation7 + $0x1], 0 }
   0x3   :  { %11 = vsyncpa [#allocation5], 0 }
   0x4   :  { %13 = vsyncpa [#allocation5 + $0x1], 0  ;;  %s850_s9 = smov 0   ;;  %s852_s10 = smov 0  }
   0x5   :  { %s854_s11 = smov 0   ;;  %s856_s12 = smov 0  }
   0x6   :  { %s858_s13 = smov 0   ;;  %s860_s14 = smov 0  }
   0x7 LB: > { %s541_s15 = sadd.s32 4294967295, %s823_s14   ;;  %s542_s16 = sadd.s32 4294967294, %s823_s14   ;;  %s823_s14 = sphi %s860_s14, %s19_s14   ;;  %s819_s13 = sphi %s858_s13, %s1027_s13   ;;  %s815_s12 = sphi %s856_s12, %s1026_s12   ;;  %s811_s11 = sphi %s854_s11, %s1025_s11   ;;  %s807_s10 = sphi %s852_s10, %s1024_s10   ;;  %s803_s9 = sphi %s850_s9, %s1023_s9  }
   0x8   : > { %p77_p0 = scmp.ne.s32.totalorder %s807_s10, %s803_s9  ;;  %p884_p1 = scmp.eq.s32.totalorder %s541_s15, 0 }
   0x9   : > { %p888_p2 = scmp.eq.s32.totalorder %s541_s15, 1  ;;  %p109_p3 = scmp.eq.s32.totalorder %s542_s16, 1 }
   0xa   : > { %p894_p4 = por %p884_p1, %p77_p0  ;;  %p543_p5 = scmp.ge.s32.totalorder %s823_s14, 1 }
   0xb   : > { %p899_p6 = por %p109_p3, %p77_p0  ;;  %p116_p7 = scmp.lt.s32.totalorder %s823_s14, 3 }
   0xc   : > { %s130_s23 = sshll.u32 %s1013_s0, 4  ;;  %s825_s25 = smov [#allocation3]   ;;  %s131_s23 = int_to_ptr.hbm [resolvable:$true] %s130_s23 }
   0xd   : > { %p907_p8 = pnand %p543_p5, %p116_p7  ;;  %s132_s26 = sshll.u32 %s825_s25, 4  ;;  %s133_s26 = int_to_ptr.vmem [resolvable:$true] %s132_s26 }
   0xe   : > { %s31_s27 = sadd.s32 1, %s819_s13  ;;  %s64_s28 = sadd.s32 1, %s811_s11 }
   0xf   : > { %p599_p10 = pneg %p907_p8  ;;  %p33_p12 = scmp.ge.s32.totalorder %s31_s27, 2 }
  0x10   : > { %p71_p13 = scmp.ne.s32.totalorder %s811_s11, %s807_s10  ;;  %p72_p0 = scmp.eq.s32.totalorder %s823_s14, 0 }
  0x11   : > { %p600_p11 = pnand %p599_p10, %p884_p1  ;;  %s1029_s27 = smov (%p33_p12, %s31_s27), 0 }
  0x12   : > { %p73_p3 = por %p72_p0, %p71_p13  ;;  %p925_p5 = por %p888_p2, %p71_p13 }
  0x13   : > { %602 = dma.hbm_to_vmem [thread:$0]  (!%p600_p11), %s131_s23, 64, %s133_s26, [#allocation4]  }
  0x14   : > { %s61_s30 = ssub.s32 %s819_s13, %s1029_s27  ;;  %p612_p7 = scmp.lt.s32.totalorder %s823_s14, 2 }
  0x15   : > { %p62_p9 = scmp.eq.s32.totalorder %s61_s30, 0  ;;  %s143_s3 = sand.u32 1, %s811_s11  }
  0x16   : > { %s588_s4 = smul.u32 6, %s143_s3  ;;  %p604_p10 = pnand %p612_p7, %p73_p3 }
  0x17   : > { %s934_s5 = scalar_select %p62_p9, %s811_s11, %s64_s28  }
  0x18   : > { %s589_s6 = smul.u32 6, %s819_s13  ;;  %s147_s7 = scalar_lea.vmem [#allocation6], %s588_s4 }
  0x19   : > { %s156_s8 = sshll.u32 %s147_s7, 4  ;;  %s144_s22 = scalar_lea.sflag [#allocation7], %s143_s3  ;;  %s157_s8 = int_to_ptr.vmem [resolvable:$true] %s156_s8 }
  0x1a   : > { %s152_s21 = scalar_lea.hbm %s1014_s1, %s589_s6  ;;  %165 = sbr.rel (%p907_p8) target bundleno = 395 (0x18b), region = 28 }
  0x1b   : > { %s154_s18 = sshll.u32 %s152_s21, 4  ;;  %s155_s18 = int_to_ptr.hbm [resolvable:$true] %s154_s18 }
  0x1c   : > { %606 = dma.hbm_to_vmem [thread:$0]  (!%p604_p10), %s155_s18, 96, %s157_s8, %s144_s22  }
  0x1f   : > { %790 = dma.done.wait (%p884_p1), [#allocation4], 64  }
  0x20   : > { %792 = vsyncadd (%p884_p1), [#allocation4], 4294967232  ;;  %s947_s23 = sand.u32 1, %s807_s10  }
  0x21   : > { %s590_s25 = smul.u32 6, %s947_s23  ;;  %s173_s26 = scalar_lea.sflag [#allocation7], %s947_s23 }
  0x23   : > { %s951_s28 = scalar_lea.vmem [#allocation6], %s590_s25 }
  0x24   : > { %794 = dma.done.wait (%p894_p4), %s173_s26, 96  }
  0x25   : > { %796 = vsyncadd (%p894_p4), %s173_s26, 4294967200  ;;  %v202_v0 = vld [vmem:[%s951_s28] sm:$0xf]  ;;  %s826_s17 = smov 127   ;;  %s827_s19 = smov 126   ;;  %vm222_vm0 = vcmask 1043456  }
  0x26   : > { %204 = vst [vmem:[#allocation1] ss:$2 sm:$0xff] %v202_v0  ;;  %v208_v1 = vld [vmem:[%s951_s28] sm:$0x3f]  ;;  %s828_s24 = smov 111   ;;  %s829_s30 = smov 110  }
  0x27   : > { %v228_v3 = vld [vmem:[%s951_s28] sm:$0x3f]  ;;  %s830_s3 = smov 96   ;;  %s831_s4 = smov 95   ;;  %vm224_vm1 = vcmask 1039360   ;;  %vm298_vm2 = vcmask 900096  }
  0x28   : > { %v246_v6 = vld [vmem:[%s951_s28] sm:$0x3f]  ;;  %s832_s6 = smov 94   ;;  %s833_s7 = smov 112   ;;  %vm279_vm3 = vcmask 908288   ;;  %v834_v45 = vmov 0  }
  0x29   : > { %v265_v9 = vld [vmem:[%s951_s28] sm:$0x3f]  ;;  %199 = vst [vmem:[#allocation2 + $0x20] sm:$0xcc] %v834_v45  ;;  %vm316_vm4 = vcmask 785408   ;;  %vm242_vm5 = vcmask 1031168  }
  0x2a   : > { %v283_v12 = vld [vmem:[%s951_s28] sm:$0x3f]  ;;  %200 = vst [vmem:[#allocation2 + $0x28] sm:$0xff] %v834_v45  ;;  %vm335_vm6 = vcmask 777216   ;;  %vm353_vm7 = vcmask 769024   ;;  %vm261_vm8 = vcmask 916480  }
  0x2b   : > { %v302_v15 = vld [vmem:[%s951_s28] sm:$0x3f]  ;;  %vm393_vm9 = vcmask 392192   ;;  %s549_s8 = sshll.u32 %s947_s23, 4  ;;  %s587_s15 = sshll.u32 %s815_s12, 4 }
  0x2c   : > { %v320_v18 = vld [vmem:[%s951_s28] sm:$0x3f]  ;;  %s441_s18 = scalar_lea.hbm %s1015_s2, %s587_s15  ;;  %s197_s22 = scalar_lea.vmem [#allocation8], %s549_s8 }
  0x2d   : > { %v205_v2 = vld.sshfl [vmem:[#allocation1] sm:$0xff pattern:$0x75643120]  ;;  %s443_s25 = sshll.u32 %s197_s22, 4  ;;  %s445_s26 = sshll.u32 %s441_s18, 4  ;;  %s444_s25 = int_to_ptr.vmem [resolvable:$true] %s443_s25  ;;  %s446_s26 = int_to_ptr.hbm [resolvable:$true] %s445_s26 }
  0x2e   : > { %211 = vst [vmem:[#allocation1 + $0x1] ss:$2 sm:$0xff] %v208_v1  ;;  %v339_v21 = vld [vmem:[%s951_s28] sm:$0x3f]  ;;  %s428_s12 = scalar_lea.sflag [#allocation5], %s947_s23  ;;  %s751_s28 = sshra.s32 %s446_s26, 4  ;;  %s752_s28 = int_to_ptr.hbm [resolvable:$true] %s751_s28 }
  0x2f   : > { %207 = vst [vmem:[#allocation2] sm:$0x33] %v205_v2  ;;  %p758_p8 = scmp.lt.s32.totalorder %s752_s28, %s1015_s2 }
  0x35   : > { %v212_v4 = vld.sshfl [vmem:[#allocation1] sm:$0xff pattern:$0x75643120]  ;;  %v214_v5 = vld.sshfl [vmem:[#allocation1 + $0x8] sm:$0xff pattern:$0x75643120] }
  0x36   : > { %216 = vrot.lane.b32.xlu1 %v212_v4, %s826_s17  ;;  %230 = vst [vmem:[#allocation1] ss:$2 sm:$0xff] %v228_v3  ;;  %218 = vrot.lane.b32.xlu2 %v214_v5, %s826_s17  ;;  %s753_s17 = scalar_lea.hbm %s752_s28, 16 }
  0x37   : > { %p754_p1 = scmp.ne.s32.totalorder %s752_s28, %s753_s17 }
  0x39   : > { %p755_p2 = pnand %p754_p1, %p925_p5 }
  0x3b   : > { %p756_p4 = pneg %p755_p2 }
  0x3d   : > { %v231_v7 = vld.sshfl [vmem:[#allocation1] sm:$0xff pattern:$0x75643120]  ;;  %v233_v8 = vld.sshfl [vmem:[#allocation1 + $0x8] sm:$0xff pattern:$0x75643120] }
  0x3e   : > { %249 = vst [vmem:[#allocation1 + $0x1] ss:$2 sm:$0xff] %v246_v6  ;;  %235 = vrot.lane.b32.xlu0 %v231_v7, %s827_s19 }
  0x45   : > { %v250_v10 = vld.sshfl [vmem:[#allocation1] sm:$0xff pattern:$0x75643120]  ;;  %v252_v11 = vld.sshfl [vmem:[#allocation1 + $0x8] sm:$0xff pattern:$0x75643120] }
  0x46   : > { %267 = vst [vmem:[#allocation1] ss:$2 sm:$0xff] %v265_v9  ;;  %v586_v9 = vld [vmem:[#allocation2 + $0x24] sm:$0xf0] }
  0x4d   : > { %v268_v13 = vld.sshfl [vmem:[#allocation1] sm:$0xff pattern:$0x75643120]  ;;  %v270_v14 = vld.sshfl [vmem:[#allocation1 + $0x8] sm:$0xff pattern:$0x75643120] }
  0x4e   : > { %272 = vrot.lane.b32.xlu1 %v268_v13, %s828_s24  ;;  %286 = vst [vmem:[#allocation1 + $0x1] ss:$2 sm:$0xff] %v283_v12 }
  0x55   : > { %v287_v16 = vld.sshfl [vmem:[#allocation1] sm:$0xff pattern:$0x75643120]  ;;  %v289_v17 = vld.sshfl [vmem:[#allocation1 + $0x8] sm:$0xff pattern:$0x75643120] }
  0x56   : > { %274 = vrot.lane.b32.xlu1 %v270_v14, %s828_s24  ;;  %304 = vst [vmem:[#allocation1] ss:$2 sm:$0xff] %v302_v15  ;;  %291 = vrot.lane.b32.xlu2 %v287_v16, %s829_s30 }
  0x5d   : > { %v307_v19 = vld.sshfl [vmem:[#allocation1 + $0x8] sm:$0xff pattern:$0x75643120]  ;;  %v305_v20 = vld.sshfl [vmem:[#allocation1] sm:$0xff pattern:$0x75643120] }
  0x5e   : > { %311 = vrot.lane.b32.xlu1 %v307_v19, %s830_s3  ;;  %309 = vrot.lane.b32.xlu0 %v305_v20, %s830_s3  ;;  %323 = vst [vmem:[#allocation1 + $0x1] ss:$2 sm:$0xff] %v320_v18 }
  0x5f   : > { %293 = vrot.lane.b32.xlu2 %v289_v17, %s829_s30  ;;  %s757_s30 = scalar_lea.hbm %s1015_s2, 32 }
  0x60   : > { %p759_p9 = scmp.lt.s32.totalorder %s757_s30, %s753_s17 }
  0x62   : > { %p760_p11 = por %p759_p9, %p758_p8 }
  0x64   : > { %p761_p12 = pnand %p760_p11, %p756_p4 }
  0x65   : > { %v324_v22 = vld.sshfl [vmem:[#allocation1] sm:$0xff pattern:$0x75643120]  ;;  %v326_v23 = vld.sshfl [vmem:[#allocation1 + $0x8] sm:$0xff pattern:$0x75643120] }
  0x66   : > { %237 = vrot.lane.b32.xlu1 %v233_v8, %s827_s19  ;;  %330 = vrot.lane.b32.xlu0 %v326_v23, %s831_s4  ;;  %341 = vst [vmem:[#allocation1] ss:$2 sm:$0xff] %v339_v21 }
  0x67   : > { %328 = vrot.lane.b32.xlu2 %v324_v22, %s831_s4 }
  0x6d   : > { %v342_v24 = vld.sshfl [vmem:[#allocation1] sm:$0xff pattern:$0x75643120]  ;;  %v344_v25 = vld.sshfl [vmem:[#allocation1 + $0x8] sm:$0xff pattern:$0x75643120] }
  0x6e   : > { %346 = vrot.lane.b32.xlu0 %v342_v24, %s832_s6 }
  0x6f   : > { %254 = vrot.lane.b32.xlu2 %v250_v10, %s833_s7  ;;  %v570_v10 = vld [vmem:[#allocation2 + $0x28] sm:$0xf0] }
  0x76   : > { %348 = vrot.lane.b32.xlu0 %v344_v25, %s832_s6 }
  0x7e   : > { %256 = vrot.lane.b32.xlu0 %v252_v11, %s833_s7 }
  0x90   : > { %v219_v26 = vpop.permute.xlu2 %218 }
  0x91   : > { %v221_v27 = vrot.slane %v219_v26, 4 }
  0xa8   : > { %v217_v28 = vpop.permute.xlu1 %216 }
  0xa9   : > { %v220_v29 = vrot.slane %v217_v28, 4 }
  0xab   : > { %v223_v30 = vsel %vm222_vm0, %v220_v29, %v221_v27  ;;  %v201_v29 = vld [vmem:[#allocation3] sm:$0xf] }
  0xac   : > { %v225_v31 = vsel %vm224_vm1, %v217_v28, %v223_v30 }
  0xad   : > { %227 = vst [vmem:[#allocation2] sm:$0xcc] %v225_v31 }
  0xb0   : > { %v292_v32 = vpop.permute.xlu2 %291  ;;  %v236_v39 = vpop.permute.xlu0 %235 }
  0xb1   : > { %v295_v33 = vrot.slane %v292_v32, 4  ;;  %v239_v54 = vrot.slane %v236_v39, 4 }
  0xb4   : > { %v552_v23 = vld [vmem:[#allocation2] sm:$0xf]  ;;  %v581_v25 = vld [vmem:[#allocation2 + $0x4] sm:$0xf] }
  0xb9   : > { %v294_v34 = vpop.permute.xlu2 %293 }
  0xba   : > { %v296_v35 = vrot.slane %v294_v34, 4 }
  0xbc   : > { %v297_v36 = vsel %vm222_vm0, %v295_v33, %v296_v35 }
  0xbd   : > { %v299_v37 = vsel %vm298_vm2, %v292_v32, %v297_v36 }
  0xbe   : > { %301 = vst [vmem:[#allocation2 + $0x10] sm:$0xcc] %v299_v37 }
  0xc0   : > { %v273_v38 = vpop.permute.xlu1 %272 }
  0xc1   : > { %v276_v40 = vrot.slane %v273_v38, 4  ;;  %v329_v52 = vpop.permute.xlu2 %328 }
  0xc2   : > { %v332_v53 = vrot.slane %v329_v52, 4 }
  0xc8   : > { %v275_v41 = vpop.permute.xlu1 %274 }
  0xc9   : > { %v277_v42 = vrot.slane %v275_v41, 4  ;;  %v255_v5 = vpop.permute.xlu2 %254 }
  0xca   : > { %v258_v6 = vrot.slane %v255_v5, 4 }
  0xcb   : > { %v278_v43 = vsel %vm222_vm0, %v276_v40, %v277_v42 }
  0xcc   : > { %v280_v44 = vsel %vm279_vm3, %v273_v38, %v278_v43 }
  0xcd   : > { %282 = vst [vmem:[#allocation2 + $0x10] sm:$0x33] %v280_v44 }
  0xd0   : > { %v312_v46 = vpop.permute.xlu1 %311  ;;  %v310_v47 = vpop.permute.xlu0 %309 }
  0xd1   : > { %v314_v48 = vrot.slane %v312_v46, 4  ;;  %v313_v49 = vrot.slane %v310_v47, 4 }
  0xd3   : > { %v315_v50 = vsel %vm222_vm0, %v313_v49, %v314_v48 }
  0xd4   : > { %v317_v51 = vsel %vm316_vm4, %v310_v47, %v315_v50  ;;  %v560_v19 = vld [vmem:[#allocation2 + $0x10] sm:$0xf]  ;;  %v583_v20 = vld [vmem:[#allocation2 + $0x14] sm:$0xf] }
  0xd5   : > { %319 = vst [vmem:[#allocation2 + $0x18] sm:$0x33] %v317_v51 }
  0xd8   : > { %v238_v55 = vpop.permute.xlu1 %237  ;;  %v331_v56 = vpop.permute.xlu0 %330 }
  0xd9   : > { %v240_v57 = vrot.slane %v238_v55, 4  ;;  %v333_v58 = vrot.slane %v331_v56, 4 }
  0xdb   : > { %v241_v59 = vsel %vm222_vm0, %v239_v54, %v240_v57  ;;  %v334_v60 = vsel %vm222_vm0, %v332_v53, %v333_v58 }
  0xdc   : > { %v243_v61 = vsel %vm242_vm5, %v236_v39, %v241_v59  ;;  %v336_v62 = vsel %vm335_vm6, %v329_v52, %v334_v60 }
  0xdd   : > { %245 = vst [vmem:[#allocation2 + $0x8] sm:$0x33] %v243_v61 }
  0xde   : > { %338 = vst [vmem:[#allocation2 + $0x18] sm:$0xcc] %v336_v62 }
  0xe0   : > { %v347_v63 = vpop.permute.xlu0 %346 }
  0xe1   : > { %v350_v1 = vrot.slane %v347_v63, 4 }
  0xe5   : > { %v584_v17 = vld [vmem:[#allocation2 + $0x14] sm:$0xf0]  ;;  %v562_v18 = vld [vmem:[#allocation2 + $0x18] sm:$0xf0] }
  0xe6   : > { %v561_v21 = vor.u32 %v584_v17, %v560_v19  ;;  %v565_v22 = vor.u32 %v583_v20, %v562_v18 }
  0xe8   : > { %v349_v0 = vpop.permute.xlu0 %348 }
  0xe9   : > { %v351_v2 = vrot.slane %v349_v0, 4 }
  0xeb   : > { %v352_v3 = vsel %vm222_vm0, %v350_v1, %v351_v2 }
  0xec   : > { %v354_v4 = vsel %vm353_vm7, %v347_v63, %v352_v3 }
  0xed   : > { %356 = vst [vmem:[#allocation2 + $0x20] sm:$0x33] %v354_v4 }
  0xf0   : > { %v257_v7 = vpop.permute.xlu0 %256 }
  0xf1   : > { %v259_v8 = vrot.slane %v257_v7, 4 }
  0xf3   : > { %v260_v11 = vsel %vm222_vm0, %v258_v6, %v259_v8 }
  0xf4   : > { %v262_v12 = vsel %vm261_vm8, %v255_v5, %v260_v11  ;;  %v568_v13 = vld [vmem:[#allocation2 + $0x20] sm:$0xf]  ;;  %v585_v14 = vld [vmem:[#allocation2 + $0x24] sm:$0xf] }
  0xf5   : > { %264 = vst [vmem:[#allocation2 + $0x8] sm:$0xcc] %v262_v12  ;;  %v569_v15 = vor.u32 %v586_v9, %v568_v13  ;;  %v573_v16 = vor.u32 %v585_v14, %v570_v10 }
  0xf7   : > { %402 = vmatpush.bf16.msra.mxu0 %v569_v15  ;;  %415 = vmatpush.bf16.msra.mxu1 %v573_v16 }
  0xfb   : > { %403 = vmatpush.bf16.msra.mxu0 %v561_v21  ;;  %416 = vmatpush.bf16.msra.mxu1 %v565_v22 }
  0xfc   : > { %v582_v24 = vld [vmem:[#allocation2 + $0x4] sm:$0xf0]  ;;  %v554_v26 = vld [vmem:[#allocation2 + $0x8] sm:$0xf0] }
  0xfd   : > { %v553_v27 = vor.u32 %v582_v24, %v552_v23  ;;  %v557_v28 = vor.u32 %v581_v25, %v554_v26 }
  0xff   : > { %404 = vmatpush.bf16.msra.mxu0 %v553_v27  ;;  %417 = vmatpush.bf16.msra.mxu1 %v557_v28 }
 0x102   : > { %574 = vmatmul.msk.bf16.vlgmr.msra.gmra.mxu0 %vm393_vm9, %v201_v29  ;;  %575 = vmatmul.msk.bf16.vlgmr.msra.gmra.mxu1 %vm393_vm9, %v201_v29 }
 0x17f   : > { %v406_v30 = vpop.f32.mrf.mxu0  ;;  %v419_v31 = vpop.f32.mrf.mxu1 }
 0x180   : > { %673 = vtanh.f32 %v406_v30 }
 0x181   : > { %675 = vtanh.f32 %v419_v31 }
 0x186   : > { %v674_v32 = vpop.eup %673 }
 0x187   : > { %v676_v33 = vpop.eup %675  ;;  %v408_v34 = vpop.f32.mrf.mxu0  ;;  %425 = vst [vmem:[%s197_s22] sm:$0xff] %v674_v32 }
 0x188   : > { %v421_v35 = vpop.f32.mrf.mxu1  ;;  %426 = vst [vmem:[%s197_s22 + $0x8] sm:$0xff] %v676_v33 }
 0x189   : > { %764 = shalt.err (!%p761_p12)
}
 0x18a   : > { %597 = dma.vmem_to_hbm [thread:$0]  (%p925_p5), %s444_s25, 256, %s446_s26, %s428_s12  }
 0x18b PF: > { %s457_s23 = sand.u32 1, %s803_s9   ;;  %p1022_p13 = scmp.ge.s32.totalorder %s823_s14, 2 }
 0x18c   : > { %s458_s6 = scalar_lea.sflag [#allocation5], %s457_s23 }
 0x18d   : > { %p608_p0 = pnand %p1022_p13, %p899_p6 }
 0x18f   : > { %p609_p3 = pneg %p608_p0 }
 0x191   : > { %798 = dma.done.wait (%p609_p3), %s458_s6, 256  }
 0x192   : > { %800 = vsyncadd (%p609_p3), %s458_s6, 4294967040  ;;  %s19_s14 = sadd.s32 1, %s823_s14   ;;  %s1023_s9 = smov %s807_s10 }
 0x193   : > { %p16_p7 = scmp.ge.s32.totalorder %s19_s14, 4   ;;  %s1024_s10 = smov %s811_s11 }
 0x194   : > { %s1025_s11 = smov %s934_s5  ;;  %s1026_s12 = smov %s819_s13 }
 0x195   : > { %s1027_s13 = smov %s1029_s27  ;;  %18 = sbr.rel (!%p16_p7) target bundleno = 7 (0x7), region = 83 }
 0x19a   :  { %464 = vsyncpa [#allocation4], 1 }
 0x19b   :  { %466 = vsyncpa [#allocation4 + $0x1], 1 }
 0x19c   :  { %467 = vsyncpa [#allocation7], 1 }
 0x19d   :  { %469 = vsyncpa [#allocation7 + $0x1], 1 }
 0x19e   :  { %470 = vsyncpa [#allocation5], 1 }
 0x19f   :  { %472 = vsyncpa [#allocation5 + $0x1], 1 }

</bundles_post_ra>
